<compile_context>
chip_gen: v7x
topology: tpu7x:2x2x1
jax: 0.10.0
libtpu: 0.0.40
codegen_flags: <defaults>
</compile_context>

<pallas_src>
import functools

import jax
import jax.numpy as jnp
from jax import lax
from jax.experimental import pallas as pl
from jax.experimental.pallas import tpu as pltpu

H1, H2 = 64, 32  # hidden sizes from the PyTorch module


def _round_up(a, b):
    return ((a + b - 1) // b) * b


def _choose_tiles(B, tb):
    """Pick (num_tiles, tile_size) for the batch axis."""
    tb = max(128, min(int(tb), 8192))
    nt = -(-B // tb)                      # ceil(B / tb)
    if B >= 256 and nt < 2:
        nt = 2                            # give v7x's second TensorCore work
    tb_eff = _round_up(-(-B // nt), 128)  # per-tile batch, 128-lane aligned
    return nt, tb_eff


def _make_dqn_kernel(n_obs, h3p):
    r2 = H1
    r3 = H1 + H2

    def kernel(w_ref, b_ref, x_ref, o_ref):
        x = x_ref[...]                                   # [TB, n_obs] batch-major tile
        # ---- layer 1: contract feature axis of both operands -> [64, TB] ----
        w1 = w_ref[0:H1, 0:n_obs]                        # [64, n_obs]
        b1 = b_ref[0:H1, :]                              # [64, 1] (lane 0)
        a1 = lax.dot_general(
            w1, x, dimension_numbers=(((1,), (1,)), ((), ())),
            preferred_element_type=jnp.float32) + b1
        a1 = jnp.maximum(a1, 0.0)                        # [64, TB]
        # ---- layer 2 ----
        w2 = w_ref[r2:r2 + H2, 0:H1]                     # [32, 64]
        b2 = b_ref[r2:r2 + H2, :]                        # [32, 1]
        a2 = jnp.maximum(
            jnp.dot(w2, a1, preferred_element_type=jnp.float32) + b2, 0.0)
        # ---- layer 3 (rows >= n_actions of w3/b3 are zero) ----
        w3 = w_ref[r3:r3 + h3p, 0:H2]                    # [h3p, 32]
        b3 = b_ref[r3:r3 + h3p, :]                       # [h3p, 1]
        o_ref[...] = (
            jnp.dot(w3, a2, preferred_element_type=jnp.float32) + b3
        ).astype(o_ref.dtype)

    return kernel


def pack_params(params, n_obs, n_actions):
    """Pack (w1,b1,w2,b2,w3,b3), weights [out,in], into a weight slab + bias slab."""
    w1, b1, w2, b2, w3, b3 = params
    h3p = _round_up(max(n_actions, 1), 8)
    rows = H1 + H2 + h3p
    width = max(128, _round_up(max(n_obs, H1, H2), 128))
    w_slab = jnp.zeros((rows, width), jnp.float32)
    w_slab = w_slab.at[0:H1, 0:n_obs].set(w1)
    w_slab = w_slab.at[H1:H1 + H2, 0:H1].set(w2)
    w_slab = w_slab.at[H1 + H2:H1 + H2 + n_actions, 0:H2].set(w3)
    b_slab = jnp.zeros((rows, 1), jnp.float32)
    b_slab = b_slab.at[0:H1, 0].set(b1)
    b_slab = b_slab.at[H1:H1 + H2, 0].set(b2)
    b_slab = b_slab.at[H1 + H2:H1 + H2 + n_actions, 0].set(b3)
    return w_slab, b_slab


@functools.partial(jax.jit, static_argnames=("n_actions", "tb"))
def dqn_forward(x, w_slab, b_slab, *, n_actions, tb=2048):
    """x: [B, n_obs] f32  ->  [B, n_actions] f32 (matches DQN.forward)."""
    B, n_obs = x.shape
    x = x.astype(jnp.float32)
    h3p = _round_up(max(n_actions, 1), 8)

    nt, tb_eff = _choose_tiles(B, tb)
    b_pad = nt * tb_eff
    if b_pad != B:
        # cheap batch-major zero-pad (no transpose); skipped for aligned batches
        x = jnp.zeros((b_pad, n_obs), jnp.float32).at[:B, :].set(x)

    kernel = _make_dqn_kernel(n_obs, h3p)
    out_t = pl.pallas_call(
        kernel,
        out_shape=jax.ShapeDtypeStruct((h3p, b_pad), jnp.float32),
        grid=(nt,),
        in_specs=[
            # weight slab: constant index_map -> fetched once, VMEM-resident
            pl.BlockSpec(w_slab.shape, lambda i: (0, 0)),
            # bias slab: constant index_map, biases at lane 0
            pl.BlockSpec(b_slab.shape, lambda i: (0, 0)),
            # batch-major activation tiles stream over the batch grid axis
            pl.BlockSpec((tb_eff, n_obs), lambda i: (i, 0)),
        ],
        # feature-major output: batch on lanes -> lane-dense, unmasked stores
        out_specs=pl.BlockSpec((h3p, tb_eff), lambda i: (0, i)),
        compiler_params=pltpu.CompilerParams(
            dimension_semantics=("parallel",)),
    )(w_slab, b_slab, x)
    return out_t[:n_actions, :B].T


def init_params(key, n_observations, n_actions):
    """nn.Linear default init (uniform +-1/sqrt(fan_in)); weights are [out, in]."""
    dims = [(n_observations, H1), (H1, H2), (H2, n_actions)]
    params = []
    for i, (fan_in, fan_out) in enumerate(dims):
        kw, kb = jax.random.split(jax.random.fold_in(key, i))
        bound = 1.0 / float(fan_in) ** 0.5
        w = jax.random.uniform(kw, (fan_out, fan_in), jnp.float32, -bound, bound)
        b = jax.random.uniform(kb, (fan_out,), jnp.float32, -bound, bound)
        params += [w, b]
    return tuple(params)


def _reference(x, params):
    w1, b1, w2, b2, w3, b3 = params
    h = jnp.maximum(x @ w1.T + b1, 0.0)
    h = jnp.maximum(h @ w2.T + b2, 0.0)
    return h @ w3.T + b3


if __name__ == "__main__":
    n_observations, n_actions = 16, 4
    key = jax.random.PRNGKey(0)
    k_x1, k_x2, k_x3, k_p = jax.random.split(key, 4)

    params = init_params(k_p, n_observations, n_actions)
    w_slab, b_slab = pack_params(params, n_observations, n_actions)

    # 1) action-selection style tiny batch (single tile, batch padded to 128)
    x_small = jax.random.normal(k_x1, (8, n_observations), jnp.float32)
    out_small = dqn_forward(x_small, w_slab, b_slab, n_actions=n_actions)
    jax.block_until_ready(out_small)
    assert out_small.shape == (8, n_actions)
    assert jnp.allclose(out_small, _reference(x_small, params), atol=1e-5), \
        "small-batch mismatch vs reference"

    # 2) replay-buffer batch, 3 exact tiles of 128 (exercises the batch grid, no padding)
    x_big = jax.random.normal(k_x2, (384, n_observations), jnp.float32)
    out_big = dqn_forward(x_big, w_slab, b_slab, n_actions=n_actions, tb=128)
    jax.block_until_ready(out_big)
    assert out_big.shape == (384, n_actions)
    assert jnp.allclose(out_big, _reference(x_big, params), atol=1e-5), \
        "big-batch mismatch vs reference"

    # 3) default tile policy: awkward batch -> 2 parallel tiles (v7x megacore) + padding path
    x_mid = jax.random.normal(k_x3, (300, n_observations), jnp.float32)
    out_mid = dqn_forward(x_mid, w_slab, b_slab, n_actions=n_actions)
    jax.block_until_ready(out_mid)
    assert out_mid.shape == (300, n_actions)
    assert jnp.allclose(out_mid, _reference(x_mid, params), atol=1e-5), \
        "mid-batch mismatch vs reference"

    print("KERNEL_OK")
</pallas_src>

<mosaic_0001>
module attributes {stable_mosaic.version = 11 : i64} {
  func.func @kernel(%arg0: i32, %arg1: memref<104x128xf32, #tpu.memory_space<vmem>>, %arg2: memref<104x1xf32, #tpu.memory_space<vmem>>, %arg3: memref<128x16xf32, #tpu.memory_space<vmem>>, %arg4: memref<8x128xf32, #tpu.memory_space<vmem>>) attributes {dimension_semantics = [#tpu.dimension_semantics<parallel>], iteration_bounds = array<i64: 1>, scalar_prefetch = 0 : i64, scratch_operands = 0 : i64, tpu.core_type = #tpu.core_type<tc>, window_params = [{pipeline_mode = #tpu.pipeline_mode<synchronous>, transform_indices = @transform_0, window_bounds = array<i64: 104, 128>}, {pipeline_mode = #tpu.pipeline_mode<synchronous>, transform_indices = @transform_1, window_bounds = array<i64: 104, 1>}, {transform_indices = @transform_2, window_bounds = array<i64: 128, 16>}, {transform_indices = @transform_3, window_bounds = array<i64: 8, 128>}]} {
    %c0 = arith.constant 0 : index
    %c0_0 = arith.constant 0 : index
    %0 = vector.load %arg3[%c0, %c0_0] : memref<128x16xf32, #tpu.memory_space<vmem>>, vector<128x16xf32>
    %c0_1 = arith.constant 0 : index
    %c0_2 = arith.constant 0 : index
    %1 = vector.load %arg1[%c0_1, %c0_2] : memref<104x128xf32, #tpu.memory_space<vmem>>, vector<64x16xf32>
    %c0_3 = arith.constant 0 : index
    %c0_4 = arith.constant 0 : index
    %2 = vector.load %arg2[%c0_3, %c0_4] : memref<104x1xf32, #tpu.memory_space<vmem>>, vector<64x1xf32>
    %cst = arith.constant dense<0.000000e+00> : vector<64x128xf32>
    %3 = tpu.matmul %1, %0, %cst {dimension_numbers = #tpu.dot_dimension_numbers<[1], [1], [0], [0], [0, 0, 1, 0], [], []>} : vector<64x16xf32>, vector<128x16xf32>, vector<64x128xf32> -> vector<64x128xf32>
    %4 = vector.broadcast %2 : vector<64x1xf32> to vector<64x128xf32>
    %5 = arith.addf %3, %4 : vector<64x128xf32>
    %cst_5 = arith.constant 0.000000e+00 : f32
    %6 = vector.broadcast %cst_5 : f32 to vector<64x128xf32>
    %7 = arith.maximumf %5, %6 : vector<64x128xf32>
    %c64 = arith.constant 64 : index
    %c0_6 = arith.constant 0 : index
    %8 = vector.load %arg1[%c64, %c0_6] : memref<104x128xf32, #tpu.memory_space<vmem>>, vector<32x64xf32>
    %c64_7 = arith.constant 64 : index
    %c0_8 = arith.constant 0 : index
    %9 = vector.load %arg2[%c64_7, %c0_8] : memref<104x1xf32, #tpu.memory_space<vmem>>, vector<32x1xf32>
    %cst_9 = arith.constant dense<0.000000e+00> : vector<32x128xf32>
    %10 = tpu.matmul %8, %7, %cst_9 {dimension_numbers = #tpu.dot_dimension_numbers<[1], [0], [0], [1], [0, 0, 1, 1], [], []>} : vector<32x64xf32>, vector<64x128xf32>, vector<32x128xf32> -> vector<32x128xf32>
    %11 = vector.broadcast %9 : vector<32x1xf32> to vector<32x128xf32>
    %12 = arith.addf %10, %11 : vector<32x128xf32>
    %cst_10 = arith.constant 0.000000e+00 : f32
    %13 = vector.broadcast %cst_10 : f32 to vector<32x128xf32>
    %14 = arith.maximumf %12, %13 : vector<32x128xf32>
    %c96 = arith.constant 96 : index
    %c0_11 = arith.constant 0 : index
    %15 = vector.load %arg1[%c96, %c0_11] : memref<104x128xf32, #tpu.memory_space<vmem>>, vector<8x32xf32>
    %c96_12 = arith.constant 96 : index
    %c0_13 = arith.constant 0 : index
    %16 = vector.load %arg2[%c96_12, %c0_13] : memref<104x1xf32, #tpu.memory_space<vmem>>, vector<8x1xf32>
    %cst_14 = arith.constant dense<0.000000e+00> : vector<8x128xf32>
    %17 = tpu.matmul %15, %14, %cst_14 {dimension_numbers = #tpu.dot_dimension_numbers<[1], [0], [0], [1], [0, 0, 1, 1], [], []>} : vector<8x32xf32>, vector<32x128xf32>, vector<8x128xf32> -> vector<8x128xf32>
    %18 = vector.broadcast %16 : vector<8x1xf32> to vector<8x128xf32>
    %19 = arith.addf %17, %18 : vector<8x128xf32>
    %c0_15 = arith.constant 0 : index
    %c0_16 = arith.constant 0 : index
    %20 = vector.load %arg4[%c0_15, %c0_16] : memref<8x128xf32, #tpu.memory_space<vmem>>, vector<8x128xf32>
    tpu.vector_store %arg4[%c0_15, %c0_16], %19 {strides = array<i32>} : memref<8x128xf32, #tpu.memory_space<vmem>>, vector<8x128xf32>,
    return
  }
  func.func @transform_0(%arg0: i32) -> (i32, i32) {
    %c0_i32 = arith.constant 0 : i32
    %c0_i32_0 = arith.constant 0 : i32
    %c0_i32_1 = arith.constant 0 : i32
    return %c0_i32, %c0_i32_0 : i32, i32
  }
  func.func @transform_1(%arg0: i32) -> (i32, i32) {
    %c0_i32 = arith.constant 0 : i32
    %c0_i32_0 = arith.constant 0 : i32
    %c0_i32_1 = arith.constant 0 : i32
    return %c0_i32, %c0_i32_0 : i32, i32
  }
  func.func @transform_2(%arg0: i32) -> (i32, i32) {
    %c0_i32 = arith.constant 0 : i32
    %c0_i32_0 = arith.constant 0 : i32
    return %arg0, %c0_i32 : i32, i32
  }
  func.func @transform_3(%arg0: i32) -> (i32, i32) {
    %c0_i32 = arith.constant 0 : i32
    %c0_i32_0 = arith.constant 0 : i32
    return %c0_i32, %arg0 : i32, i32
  }
}

</mosaic_0001>

<bundles_post_ra>
// kernel: dqn_forward.1
= control target key start
LH: loop header
LB: loop body
LE: loop exit
PB: predicated region body
PF: predicated region fallthrough
CT: control target
= control target key end

     0   :  { %vm86_vm0 = vcmask 130048   ;;  %v711_v3 = vmov 0   ;;  %vm300_vm2 = vcmask 523264   ;;  %vm713_vm3 = vmmov 0   ;;  %s914_s2 = inlined_call_operand.vmem [shape: f32[128,16], index: 2, kind: input, shape index: {}]   ;;  %s915_s0 = inlined_call_operand.vmem [shape: f32[104,128], index: 0, kind: input, shape index: {}]   ;;  %s916_s1 = inlined_call_operand.vmem [shape: f32[104,1], index: 1, kind: input, shape index: {}]   ;;  %s917_s3 = inlined_call_operand.vmem [shape: f32[8,128], index: 3, kind: output, shape index: {}]  }
   0x1   :  { %v14_v0 = vld [vmem:[%s914_s2] sm:$0xff]  ;;  %v15_v1 = vld [vmem:[%s914_s2 + $0x8] sm:$0xff]  ;;  %vm743_vm1 = vmpackc.low %vm86_vm0, %vm86_vm0  ;;  %709 = vset.pattern.permute.xlu0 %v711_v3  ;;  %710 = vset.pattern.permute.xlu1 %v711_v3  ;;  %vm409_vm4 = vcmask 261120  }
   0x2   :  { %v635_v4 = vpack.c.bf16 %v15_v1, %v14_v0  ;;  %v16_v5 = vld [vmem:[%s914_s2 + $0x10] sm:$0xff]  ;;  %v17_v6 = vld [vmem:[%s914_s2 + $0x18] sm:$0xff]  ;;  %v30_v8 = vld [vmem:[%s915_s0] sm:$0xff] }
   0x3   :  { %v641_v7 = vpack.c.bf16 %v17_v6, %v16_v5  ;;  %v18_v9 = vld [vmem:[%s914_s2 + $0x20] sm:$0xff]  ;;  %v19_v10 = vld [vmem:[%s914_s2 + $0x28] sm:$0xff]  ;;  %590 = vmatprep.mubr.msk.f32.mxu0 %vm86_vm0, %v30_v8  ;;  %v40_v13 = vld [vmem:[%s916_s1 + $0x10] sm:$0xff] }
   0x4   :  { %637 = vmatprep.subr.msk.bf16.mxu0 %vm743_vm1, %v635_v4  ;;  %v38_v11 = vld [vmem:[%s916_s1] sm:$0xff]  ;;  %v647_v12 = vpack.c.bf16 %v19_v10, %v18_v9  ;;  %v39_v14 = vld [vmem:[%s916_s1 + $0x8] sm:$0xff]  ;;  %58 = vperm.xlu1 %710, %v40_v13   ;;  %v41_v15 = vld [vmem:[%s916_s1 + $0x18] sm:$0xff] }
   0x5   :  { %640 = vmatpush3.bf16.xpose.msk.msra.mxu0 %vm743_vm1, %v635_v4  ;;  %48 = vperm.xlu0 %709, %v38_v11   ;;  %v20_v16 = vld [vmem:[%s914_s2 + $0x30] sm:$0xff]  ;;  %v21_v17 = vld [vmem:[%s914_s2 + $0x38] sm:$0xff]  ;;  %v42_v18 = vld [vmem:[%s916_s1 + $0x20] sm:$0xff] }
   0x6   :  { %643 = vmatprep.subr.msk.bf16.mxu0 %vm743_vm1, %v641_v7  ;;  %v43_v19 = vld [vmem:[%s916_s1 + $0x28] sm:$0xff]  ;;  %v653_v20 = vpack.c.bf16 %v21_v17, %v20_v16  ;;  %v44_v21 = vld [vmem:[%s916_s1 + $0x30] sm:$0xff]  ;;  %v45_v22 = vld [vmem:[%s916_s1 + $0x38] sm:$0xff] }
   0x7   :  { %v22_v23 = vld [vmem:[%s914_s2 + $0x40] sm:$0xff]  ;;  %v23_v24 = vld [vmem:[%s914_s2 + $0x48] sm:$0xff]  ;;  %v278_v28 = vld [vmem:[%s916_s1 + $0x50] sm:$0xff] }
   0x8   :  { %63 = vperm.xlu1 %710, %v41_v15   ;;  %v276_v25 = vld [vmem:[%s916_s1 + $0x40] sm:$0xff]  ;;  %v277_v26 = vld [vmem:[%s916_s1 + $0x48] sm:$0xff]  ;;  %v659_v27 = vpack.c.bf16 %v23_v24, %v22_v23  ;;  %v279_v29 = vld [vmem:[%s916_s1 + $0x58] sm:$0xff]  ;;  %v712_v23 = vmov 0.0|0.0   ;;  %v714_v24 = vmov 0.0  }
   0x9   :  { %53 = vperm.xlu0 %709, %v39_v14   ;;  %v24_v30 = vld [vmem:[%s914_s2 + $0x50] sm:$0xff]  ;;  %v25_v31 = vld [vmem:[%s914_s2 + $0x58] sm:$0xff]  ;;  %v403_v32 = vld [vmem:[%s916_s1 + $0x60] sm:$0xff] }
   0xa   :  { %v665_v33 = vpack.c.bf16 %v25_v31, %v24_v30  ;;  %v26_v34 = vld [vmem:[%s914_s2 + $0x60] sm:$0xff]  ;;  %v27_v35 = vld [vmem:[%s914_s2 + $0x68] sm:$0xff]  ;;  %v28_v37 = vld [vmem:[%s914_s2 + $0x70] sm:$0xff] }
   0xb   :  { %v671_v36 = vpack.c.bf16 %v27_v35, %v26_v34  ;;  %v29_v38 = vld [vmem:[%s914_s2 + $0x78] sm:$0xff]  ;;  %v31_v40 = vld [vmem:[%s915_s0 + $0x8] sm:$0xff]  ;;  %v32_v41 = vld [vmem:[%s915_s0 + $0x10] sm:$0xff] }
   0xc   :  { %73 = vperm.xlu1 %710, %v43_v19   ;;  %v677_v39 = vpack.c.bf16 %v29_v38, %v28_v37  ;;  %v33_v42 = vld [vmem:[%s915_s0 + $0x18] sm:$0xff]  ;;  %v34_v43 = vld [vmem:[%s915_s0 + $0x20] sm:$0xff]  ;;  %v35_v44 = vld [vmem:[%s915_s0 + $0x28] sm:$0xff] }
   0xd   :  { %646 = vmatpush3.bf16.xpose.msk.msra.mxu0 %vm743_vm1, %v641_v7  ;;  %68 = vperm.xlu0 %709, %v42_v18   ;;  %v36_v45 = vld [vmem:[%s915_s0 + $0x30] sm:$0xff]  ;;  %v37_v46 = vld [vmem:[%s915_s0 + $0x38] sm:$0xff]  ;;  %v272_v47 = vld [vmem:[%s915_s0 + $0x40] sm:$0xff] }
   0xe   :  { %649 = vmatprep.subr.msk.bf16.mxu0 %vm743_vm1, %v647_v12  ;;  %618 = vmatprep.mubr.msk.f32.mxu1 %vm300_vm2, %v272_v47 }
  0x10   :  { %83 = vperm.xlu1 %710, %v45_v22   ;;  %v275_v22 = vld [vmem:[%s915_s0 + $0x58] sm:$0xff] }
  0x11   :  { %78 = vperm.xlu0 %709, %v44_v21   ;;  %v274_v21 = vld [vmem:[%s915_s0 + $0x50] sm:$0xff] }
  0x14   :  { %287 = vperm.xlu1 %710, %v277_v26  }
  0x15   :  { %652 = vmatpush3.bf16.xpose.msk.msra.mxu0 %vm743_vm1, %v647_v12  ;;  %282 = vperm.xlu0 %709, %v276_v25  }
  0x16   :  { %655 = vmatprep.subr.msk.bf16.mxu0 %vm743_vm1, %v653_v20 }
  0x18   :  { %297 = vperm.xlu1 %710, %v279_v29  }
  0x19   :  { %292 = vperm.xlu0 %709, %v278_v28  }
  0x1d   :  { %658 = vmatpush3.bf16.xpose.msk.msra.mxu0 %vm743_vm1, %v653_v20  ;;  %406 = vperm.xlu0 %709, %v403_v32   ;;  %v273_v20 = vld [vmem:[%s915_s0 + $0x48] sm:$0xff] }
  0x1e   :  { %661 = vmatprep.subr.msk.bf16.mxu0 %vm743_vm1, %v659_v27 }
  0x25   :  { %664 = vmatpush3.bf16.xpose.msk.msra.mxu0 %vm743_vm1, %v659_v27 }
  0x26   :  { %667 = vmatprep.subr.msk.bf16.mxu0 %vm743_vm1, %v665_v33 }
  0x2d   :  { %670 = vmatpush3.bf16.xpose.msk.msra.mxu0 %vm743_vm1, %v665_v33 }
  0x2e   :  { %673 = vmatprep.subr.msk.bf16.mxu0 %vm743_vm1, %v671_v36 }
  0x35   :  { %676 = vmatpush3.bf16.xpose.msk.msra.mxu0 %vm743_vm1, %v671_v36 }
  0x36   :  { %679 = vmatprep.subr.msk.bf16.mxu0 %vm743_vm1, %v677_v39 }
  0x3d   :  { %682 = vmatpush3.bf16.xpose.msk.msra.mxu0 %vm743_vm1, %v677_v39 }
  0x44   :  { %591 = vmatmul.mubr.msk.f32.vlgmr.msra.gmra.mrb[0].mxu0 %vm86_vm0, %v31_v40 }
  0x45   :  { %593 = vmatprep.mubr.msk.f32.mxu0 %vm86_vm0, %v32_v41 }
  0x48   :  { %594 = vmatmul.mubr.msk.f32.gmra.mrb[2].mxu0 %vm86_vm0, %v33_v42 }
  0x49   :  { %596 = vmatprep.mubr.msk.f32.mxu0 %vm86_vm0, %v34_v43  ;;  %v402_v43 = vld [vmem:[%s915_s0 + $0x60] sm:$0xff] }
  0x4c   :  { %597 = vmatmul.mubr.msk.f32.gmra.mrb[4].mxu0 %vm86_vm0, %v35_v44 }
  0x4d   :  { %599 = vmatprep.mubr.msk.f32.mxu0 %vm86_vm0, %v36_v45 }
  0x50   :  { %600 = vmatmul.mubr.msk.f32.gmra.mrb[6].mxu0 %vm86_vm0, %v37_v46 }
  0x83   :  { %v59_v49 = vpop.permute.xlu1 %58 }
  0x84   :  { %v49_v48 = vpop.permute.xlu0 %48 }
  0x87   :  { %v64_v51 = vpop.permute.xlu1 %63 }
  0x88   :  { %v54_v50 = vpop.permute.xlu0 %53 }
  0x8b   :  { %v74_v61 = vpop.permute.xlu1 %73 }
  0x8c   :  { %v69_v0 = vpop.permute.xlu0 %68 }
  0x8f   :  { %v84_v9 = vpop.permute.xlu1 %83 }
  0x90   :  { %v79_v12 = vpop.permute.xlu0 %78 }
  0x93   :  { %v288_v25 = vpop.permute.xlu1 %287 }
  0x94   :  { %v283_v26 = vpop.permute.xlu0 %282 }
  0x97   :  { %v298_v32 = vpop.permute.xlu1 %297 }
  0x98   :  { %v293_v35 = vpop.permute.xlu0 %292 }
  0x9c   :  { %v407_v44 = vpop.permute.xlu0 %406 }
 0x117   :  { %v592_v52 = vpop.f32.mrb[0].mxu0 }
 0x118   :  { %v231_v53 = vadd.f32 %v592_v52, %v54_v50  ;;  %v225_v54 = vpop.f32.mrb[1].mxu0 }
 0x119   :  { %v226_v55 = vadd.f32 %v225_v54, %v49_v48 }
 0x11a   :  { %v265_v56 = vmax.f32 %v231_v53, 0.0 }
 0x11b   :  { %v264_v57 = vmax.f32 %v226_v55, 0.0  ;;  %v595_v58 = vpop.f32.mrb[2].mxu0 }
 0x11c   :  { %v241_v59 = vadd.f32 %v595_v58, %v64_v51  ;;  %v235_v60 = vpop.f32.mrb[3].mxu0 }
 0x11d   :  { %v236_v62 = vadd.f32 %v235_v60, %v59_v49  ;;  %v683_v63 = vpack.c.bf16 %v265_v56, %v264_v57 }
 0x11e   :  { %v267_v1 = vmax.f32 %v241_v59, 0.0 }
 0x11f   :  { %v266_v2 = vmax.f32 %v236_v62, 0.0  ;;  %v598_v3 = vpop.f32.mrb[4].mxu0  ;;  %684 = vmatprep.subr.bf16.mxu1 %v683_v63 }
 0x120   :  { %v251_v4 = vadd.f32 %v598_v3, %v74_v61  ;;  %v245_v5 = vpop.f32.mrb[5].mxu0  ;;  %686 = vmatpush3.bf16.msra.mxu1 %v683_v63 }
 0x121   :  { %v687_v6 = vpack.c.bf16 %v267_v1, %v266_v2  ;;  %v246_v7 = vadd.f32 %v245_v5, %v69_v0 }
 0x122   :  { %v269_v8 = vmax.f32 %v251_v4, 0.0 }
 0x123   :  { %v268_v10 = vmax.f32 %v246_v7, 0.0  ;;  %v601_v11 = vpop.f32.mrb[6].mxu0  ;;  %688 = vmatprep.subr.bf16.mxu1 %v687_v6 }
 0x124   :  { %v261_v13 = vadd.f32 %v601_v11, %v84_v9  ;;  %v255_v14 = vpop.f32.mrb[7].mxu0  ;;  %690 = vmatpush3.bf16.msra.mxu1 %v687_v6 }
 0x125   :  { %v691_v15 = vpack.c.bf16 %v269_v8, %v268_v10  ;;  %v256_v16 = vadd.f32 %v255_v14, %v79_v12 }
 0x126   :  { %v271_v17 = vmax.f32 %v261_v13, 0.0 }
 0x127   :  { %v270_v18 = vmax.f32 %v256_v16, 0.0  ;;  %692 = vmatprep.subr.bf16.mxu1 %v691_v15 }
 0x128   :  { %694 = vmatpush3.bf16.msra.mxu1 %v691_v15 }
 0x129   :  { %v695_v19 = vpack.c.bf16 %v271_v17, %v270_v18 }
 0x12b   :  { %696 = vmatprep.subr.bf16.mxu1 %v695_v19 }
 0x12c   :  { %698 = vmatpush3.bf16.msra.mxu1 %v695_v19 }
 0x12d   :  { %699 = vmatprep.subr.bf16.mxu1 %v712_v23 }
 0x12f   :  { %619 = vmatmul.mubr.msk.f32.vlgmr.msra.gmra.mrb[0].mxu1 %vm300_vm2, %v273_v20 }
 0x130   :  { %621 = vmatprep.mubr.msk.f32.mxu1 %vm300_vm2, %v274_v21 }
 0x133   :  { %622 = vmatmul.mubr.msk.f32.gmra.mrb[2].mxu1 %vm300_vm2, %v275_v22 }
 0x134   :  { %632 = vmatprep.mubr.msk.f32.mxu1 %vm713_vm3, %v714_v24 }
 0x202   :  { %v620_v27 = vpop.f32.mrb[0].mxu1 }
 0x203   :  { %v385_v28 = vadd.f32 %v620_v27, %v288_v25  ;;  %v379_v29 = vpop.f32.mrb[1].mxu1 }
 0x204   :  { %v380_v30 = vadd.f32 %v379_v29, %v283_v26 }
 0x205   :  { %v399_v31 = vmax.f32 %v385_v28, 0.0 }
 0x206   :  { %v398_v33 = vmax.f32 %v380_v30, 0.0  ;;  %v623_v34 = vpop.f32.mrb[2].mxu1 }
 0x207   :  { %v395_v36 = vadd.f32 %v623_v34, %v298_v32  ;;  %v389_v37 = vpop.f32.mrb[3].mxu1 }
 0x208   :  { %v700_v38 = vpack.c.bf16 %v399_v31, %v398_v33  ;;  %v390_v39 = vadd.f32 %v389_v37, %v293_v35 }
 0x209   :  { %v401_v40 = vmax.f32 %v395_v36, 0.0 }
 0x20a   :  { %v400_v41 = vmax.f32 %v390_v39, 0.0  ;;  %701 = vmatpush3.bf16.msra.mxu1 %v700_v38 }
 0x20b   :  { %702 = vmatprep.subr.bf16.mxu1 %v712_v23 }
 0x20c   :  { %v703_v42 = vpack.c.bf16 %v401_v40, %v400_v41 }
 0x20e   :  { %704 = vmatpush3.bf16.msra.mxu1 %v703_v42 }
 0x211   :  { %633 = vmatmul.mubr.msk.f32.vlgmr.msra.gmra.mrb[4].mxu1 %vm409_vm4, %v402_v43 }
 0x2e4   :  { %v479_v45 = vpop.f32.mrb[4].mxu1 }
 0x2e5   :  { %v480_v46 = vadd.f32 %v479_v45, %v407_v44  ;;  %v634_v47 = vpop.f32.mrb[5].mxu1 }
 0x2e7   :  { %483 = vst [vmem:[%s917_s3] sm:$0xff] %v480_v46 }

</bundles_post_ra>
